<compile_context>
chip_gen: v7x
topology: tpu7x:2x2x1
jax: 0.10.0
libtpu: 0.0.40
codegen_flags: <defaults>
</compile_context>

<pallas_src>
import functools

import jax
import jax.numpy as jnp
from jax.experimental import pallas as pl
from jax.experimental.pallas import tpu as pltpu


def _fused_lstm_cells_kernel(x_ref, state_ref, *refs, num_layers, hidden_size):
    """All stacked LSTMCell layers in one invocation.

    x_ref     : (B, D_in)      f32   layer-0 input (cast to bf16 in-register)
    state_ref : (B, 2*L*H)     f32   [h_0 | .. | h_{L-1} | c_0 | .. | c_{L-1}]
    refs      : L x (D_l, 4H)  bf16  W_ih^T per layer
                (L, H, 4H)     bf16  W_hh^T stacked
                (L, B, 4H)     f32   (b_ih + b_hh), pre-broadcast over batch
                (B, 2*L*H)     f32   output state slab (same layout as input)
    """
    L, H = num_layers, hidden_size
    w_ih_refs = refs[:L]
    w_hh_ref = refs[L]
    b_ref = refs[L + 1]
    state_out_ref = refs[L + 2]

    state = state_ref[...]                       # one full-width (B, 128) load
    h_prev = [state[:, l * H:(l + 1) * H] for l in range(L)]
    c_prev = [state[:, (L + l) * H:(L + l + 1) * H] for l in range(L)]

    # Recurrent halves depend only on kernel inputs -> issue them all before
    # the serial layer chain so MXU work overlaps the per-layer gate math.
    rec = [jnp.dot(h_prev[l].astype(jnp.bfloat16), w_hh_ref[l],
                   preferred_element_type=jnp.float32)
           for l in range(L)]

    x = x_ref[...].astype(jnp.bfloat16)
    h_new, c_new = [], []
    for l in range(L):
        gates = jnp.dot(x, w_ih_refs[l][...],
                        preferred_element_type=jnp.float32)
        gates = gates + rec[l] + b_ref[l]                    # (B, 4H) f32

        # Full-tile nonlinearities on the EUP: sigmoid(z) = 0.5*tanh(0.5 z)+0.5
        sig = 0.5 * jnp.tanh(0.5 * gates) + 0.5              # i, f, o gates
        th = jnp.tanh(gates)                                 # g gate

        i_g = sig[:, 0 * H:1 * H]
        f_g = sig[:, 1 * H:2 * H]
        g_g = th[:, 2 * H:3 * H]
        o_g = sig[:, 3 * H:4 * H]

        c_l = f_g * c_prev[l] + i_g * g_g
        h_l = o_g * jnp.tanh(c_l)
        h_new.append(h_l)
        c_new.append(c_l)
        x = h_l.astype(jnp.bfloat16)     # feeds next layer; never leaves vregs

    # Single unmasked, lane-dense (B, 2*L*H) store of the whole new state.
    state_out_ref[...] = jnp.concatenate(h_new + c_new, axis=-1)


def lstm_cells_forward(x, hidden, w_ih_list, w_hh_stack, b_stack):
    """Mirrors LSTMCells.forward: returns (h_stack, c_stack), each (L, B, H)."""
    h0, c0 = hidden
    L, B, H = h0.shape

    # Wrapper-side layout plumbing: (L, B, H) x 2 -> lane-dense (B, 2*L*H).
    state_in = jnp.concatenate(
        [jnp.transpose(h0, (1, 0, 2)).reshape(B, L * H),
         jnp.transpose(c0, (1, 0, 2)).reshape(B, L * H)], axis=-1)

    kernel = functools.partial(_fused_lstm_cells_kernel,
                               num_layers=L, hidden_size=H)

    flops = (sum(2 * B * w.shape[0] * 4 * H for w in w_ih_list)
             + L * 2 * B * H * 4 * H)
    transcendentals = L * B * 9 * H       # 2 full-gate tanh passes + tanh(c)
    bytes_accessed = (4 * x.size + 2 * 4 * state_in.size
                      + 2 * sum(w.size for w in w_ih_list)
                      + 2 * w_hh_stack.size + 4 * b_stack.size)

    vmem = pltpu.MemorySpace.VMEM
    n_in = 2 + len(w_ih_list) + 2
    state_out = pl.pallas_call(
        kernel,
        out_shape=jax.ShapeDtypeStruct((B, 2 * L * H), jnp.float32),
        in_specs=[pl.BlockSpec(memory_space=vmem)] * n_in,
        out_specs=pl.BlockSpec(memory_space=vmem),
        input_output_aliases={1: 0},          # state slab updated in place
        cost_estimate=pl.CostEstimate(flops=flops,
                                      transcendentals=transcendentals,
                                      bytes_accessed=bytes_accessed),
    )(x, state_in, *w_ih_list, w_hh_stack, b_stack)

    h_out = jnp.transpose(state_out[:, :L * H].reshape(B, L, H), (1, 0, 2))
    c_out = jnp.transpose(state_out[:, L * H:].reshape(B, L, H), (1, 0, 2))
    return h_out, c_out


def init_lstm_cells_params(key, input_size, hidden_size, num_layers=2):
    """Deterministic synthetic params in PyTorch LSTMCell layout."""
    H = hidden_size
    d_in = input_size
    k = 1.0 / float(jnp.sqrt(jnp.float32(H)))
    layer_params, in_widths = [], []
    for _ in range(num_layers):
        key, k1, k2, k3, k4 = jax.random.split(key, 5)
        w_ih = jax.random.uniform(k1, (4 * H, d_in), jnp.float32, -k, k)
        w_hh = jax.random.uniform(k2, (4 * H, H), jnp.float32, -k, k)
        b_ih = jax.random.uniform(k3, (4 * H,), jnp.float32, -k, k)
        b_hh = jax.random.uniform(k4, (4 * H,), jnp.float32, -k, k)
        layer_params.append((w_ih, w_hh, b_ih, b_hh))
        in_widths.append(d_in)
        d_in = H
    return layer_params, tuple(in_widths)


def pack_params(layer_params, batch_size, hidden_size):
    """Per-layer W_ih^T (bf16), stacked W_hh^T (bf16), pre-broadcast bias."""
    H = hidden_size
    w_ih_list = [w_ih.T.astype(jnp.bfloat16)
                 for (w_ih, _, _, _) in layer_params]
    w_hh_stack = jnp.stack([w_hh.T.astype(jnp.bfloat16)
                            for (_, w_hh, _, _) in layer_params], axis=0)
    b_stack = jnp.stack(
        [jnp.broadcast_to((b_ih + b_hh)[None, :], (batch_size, 4 * H))
         for (_, _, b_ih, b_hh) in layer_params], axis=0).astype(jnp.float32)
    return w_ih_list, w_hh_stack, b_stack


def _reference_forward(layer_params, x, hidden):
    """Pure-JAX f32 reference matching PyTorch nn.LSTMCell semantics."""
    h0, c0 = hidden
    H = h0.shape[-1]
    hs, cs = [], []
    inp = x
    for i, (w_ih, w_hh, b_ih, b_hh) in enumerate(layer_params):
        gates = inp @ w_ih.T + h0[i] @ w_hh.T + b_ih + b_hh
        ig = jax.nn.sigmoid(gates[:, 0 * H:1 * H])
        fg = jax.nn.sigmoid(gates[:, 1 * H:2 * H])
        gg = jnp.tanh(gates[:, 2 * H:3 * H])
        og = jax.nn.sigmoid(gates[:, 3 * H:4 * H])
        c = fg * c0[i] + ig * gg
        h = og * jnp.tanh(c)
        inp = h
        hs.append(h)
        cs.append(c)
    return jnp.stack(hs, axis=0), jnp.stack(cs, axis=0)


if __name__ == "__main__":
    B, D_IN, H, L = 8, 16, 32, 2

    key = jax.random.PRNGKey(0)
    key, kx, kh, kc = jax.random.split(key, 4)

    layer_params, in_widths = init_lstm_cells_params(key, D_IN, H, L)
    w_ih_list, w_hh_stack, b_stack = pack_params(layer_params, B, H)

    x = jax.random.normal(kx, (B, D_IN), jnp.float32)
    h0 = jax.random.normal(kh, (L, B, H), jnp.float32)
    c0 = jax.random.normal(kc, (L, B, H), jnp.float32)

    fwd = jax.jit(lstm_cells_forward)
    h_out, c_out = fwd(x, (h0, c0), w_ih_list, w_hh_stack, b_stack)
    jax.block_until_ready((h_out, c_out))

    h_ref, c_ref = _reference_forward(layer_params, x, (h0, c0))
    assert h_out.shape == (L, B, H) and c_out.shape == (L, B, H)
    # bf16 MXU operands vs. f32 reference -> relaxed tolerance (review note).
    assert jnp.allclose(h_out, h_ref, atol=3e-2, rtol=3e-2), \
        float(jnp.max(jnp.abs(h_out - h_ref)))
    assert jnp.allclose(c_out, c_ref, atol=3e-2, rtol=3e-2), \
        float(jnp.max(jnp.abs(c_out - c_ref)))

    print("KERNEL_OK")
</pallas_src>

<mosaic_0001>
module attributes {stable_mosaic.version = 11 : i64} {
  func.func @_fused_lstm_cells_kernel(%arg0: memref<8x16xf32, #tpu.memory_space<vmem>>, %arg1: memref<8x128xf32, #tpu.memory_space<vmem>>, %arg2: memref<16x128xbf16, #tpu.memory_space<vmem>>, %arg3: memref<32x128xbf16, #tpu.memory_space<vmem>>, %arg4: memref<2x32x128xbf16, #tpu.memory_space<vmem>>, %arg5: memref<2x8x128xf32, #tpu.memory_space<vmem>>, %arg6: memref<8x128xf32, #tpu.memory_space<vmem>>) attributes {dimension_semantics = [], scalar_prefetch = 0 : i64, scratch_operands = 0 : i64, tpu.core_type = #tpu.core_type<tc>} {
    %c0 = arith.constant 0 : index
    %c0_0 = arith.constant 0 : index
    %0 = vector.load %arg1[%c0, %c0_0] : memref<8x128xf32, #tpu.memory_space<vmem>>, vector<8x128xf32>
    %1 = vector.extract_strided_slice %0 {offsets = [0, 0], sizes = [8, 32], strides = [1, 1]} : vector<8x128xf32> to vector<8x32xf32>
    %2 = vector.extract_strided_slice %0 {offsets = [0, 32], sizes = [8, 32], strides = [1, 1]} : vector<8x128xf32> to vector<8x32xf32>
    %3 = vector.extract_strided_slice %0 {offsets = [0, 64], sizes = [8, 32], strides = [1, 1]} : vector<8x128xf32> to vector<8x32xf32>
    %4 = vector.extract_strided_slice %0 {offsets = [0, 96], sizes = [8, 32], strides = [1, 1]} : vector<8x128xf32> to vector<8x32xf32>
    %5 = arith.truncf %1 : vector<8x32xf32> to vector<8x32xbf16>
    %c0_1 = arith.constant 0 : index
    %c0_2 = arith.constant 0 : index
    %c0_3 = arith.constant 0 : index
    %6 = vector.load %arg4[%c0_1, %c0_2, %c0_3] : memref<2x32x128xbf16, #tpu.memory_space<vmem>>, vector<1x32x128xbf16>
    %7 = vector.shape_cast %6 : vector<1x32x128xbf16> to vector<32x128xbf16>
    %cst = arith.constant dense<0.000000e+00> : vector<8x128xf32>
    %8 = tpu.matmul %5, %7, %cst {dimension_numbers = #tpu.dot_dimension_numbers<[1], [0], [0], [1], [0, 0, 1, 1], [], []>} : vector<8x32xbf16>, vector<32x128xbf16>, vector<8x128xf32> -> vector<8x128xf32>
    %9 = arith.truncf %2 : vector<8x32xf32> to vector<8x32xbf16>
    %c1 = arith.constant 1 : index
    %c0_4 = arith.constant 0 : index
    %c0_5 = arith.constant 0 : index
    %10 = vector.load %arg4[%c1, %c0_4, %c0_5] : memref<2x32x128xbf16, #tpu.memory_space<vmem>>, vector<1x32x128xbf16>
    %11 = vector.shape_cast %10 : vector<1x32x128xbf16> to vector<32x128xbf16>
    %cst_6 = arith.constant dense<0.000000e+00> : vector<8x128xf32>
    %12 = tpu.matmul %9, %11, %cst_6 {dimension_numbers = #tpu.dot_dimension_numbers<[1], [0], [0], [1], [0, 0, 1, 1], [], []>} : vector<8x32xbf16>, vector<32x128xbf16>, vector<8x128xf32> -> vector<8x128xf32>
    %c0_7 = arith.constant 0 : index
    %c0_8 = arith.constant 0 : index
    %13 = vector.load %arg0[%c0_7, %c0_8] : memref<8x16xf32, #tpu.memory_space<vmem>>, vector<8x16xf32>
    %14 = arith.truncf %13 : vector<8x16xf32> to vector<8x16xbf16>
    %c0_9 = arith.constant 0 : index
    %c0_10 = arith.constant 0 : index
    %15 = vector.load %arg2[%c0_9, %c0_10] : memref<16x128xbf16, #tpu.memory_space<vmem>>, vector<16x128xbf16>
    %cst_11 = arith.constant dense<0.000000e+00> : vector<8x128xf32>
    %16 = tpu.matmul %14, %15, %cst_11 {dimension_numbers = #tpu.dot_dimension_numbers<[1], [0], [0], [1], [0, 0, 1, 1], [], []>} : vector<8x16xbf16>, vector<16x128xbf16>, vector<8x128xf32> -> vector<8x128xf32>
    %17 = arith.addf %16, %8 : vector<8x128xf32>
    %c0_12 = arith.constant 0 : index
    %c0_13 = arith.constant 0 : index
    %c0_14 = arith.constant 0 : index
    %18 = vector.load %arg5[%c0_12, %c0_13, %c0_14] : memref<2x8x128xf32, #tpu.memory_space<vmem>>, vector<1x8x128xf32>
    %19 = vector.shape_cast %18 : vector<1x8x128xf32> to vector<8x128xf32>
    %20 = arith.addf %17, %19 : vector<8x128xf32>
    %cst_15 = arith.constant 5.000000e-01 : f32
    %21 = vector.broadcast %cst_15 : f32 to vector<8x128xf32>
    %22 = arith.mulf %21, %20 : vector<8x128xf32>
    %23 = math.tanh %22 : vector<8x128xf32>
    %cst_16 = arith.constant 5.000000e-01 : f32
    %24 = vector.broadcast %cst_16 : f32 to vector<8x128xf32>
    %25 = arith.mulf %24, %23 : vector<8x128xf32>
    %cst_17 = arith.constant 5.000000e-01 : f32
    %26 = vector.broadcast %cst_17 : f32 to vector<8x128xf32>
    %27 = arith.addf %25, %26 : vector<8x128xf32>
    %28 = math.tanh %20 : vector<8x128xf32>
    %29 = vector.extract_strided_slice %27 {offsets = [0, 0], sizes = [8, 32], strides = [1, 1]} : vector<8x128xf32> to vector<8x32xf32>
    %30 = vector.extract_strided_slice %27 {offsets = [0, 32], sizes = [8, 32], strides = [1, 1]} : vector<8x128xf32> to vector<8x32xf32>
    %31 = vector.extract_strided_slice %28 {offsets = [0, 64], sizes = [8, 32], strides = [1, 1]} : vector<8x128xf32> to vector<8x32xf32>
    %32 = vector.extract_strided_slice %27 {offsets = [0, 96], sizes = [8, 32], strides = [1, 1]} : vector<8x128xf32> to vector<8x32xf32>
    %33 = arith.mulf %30, %3 : vector<8x32xf32>
    %34 = arith.mulf %29, %31 : vector<8x32xf32>
    %35 = arith.addf %33, %34 : vector<8x32xf32>
    %36 = math.tanh %35 : vector<8x32xf32>
    %37 = arith.mulf %32, %36 : vector<8x32xf32>
    %38 = arith.truncf %37 : vector<8x32xf32> to vector<8x32xbf16>
    %c0_18 = arith.constant 0 : index
    %c0_19 = arith.constant 0 : index
    %39 = vector.load %arg3[%c0_18, %c0_19] : memref<32x128xbf16, #tpu.memory_space<vmem>>, vector<32x128xbf16>
    %cst_20 = arith.constant dense<0.000000e+00> : vector<8x128xf32>
    %40 = tpu.matmul %38, %39, %cst_20 {dimension_numbers = #tpu.dot_dimension_numbers<[1], [0], [0], [1], [0, 0, 1, 1], [], []>} : vector<8x32xbf16>, vector<32x128xbf16>, vector<8x128xf32> -> vector<8x128xf32>
    %41 = arith.addf %40, %12 : vector<8x128xf32>
    %c1_21 = arith.constant 1 : index
    %c0_22 = arith.constant 0 : index
    %c0_23 = arith.constant 0 : index
    %42 = vector.load %arg5[%c1_21, %c0_22, %c0_23] : memref<2x8x128xf32, #tpu.memory_space<vmem>>, vector<1x8x128xf32>
    %43 = vector.shape_cast %42 : vector<1x8x128xf32> to vector<8x128xf32>
    %44 = arith.addf %41, %43 : vector<8x128xf32>
    %cst_24 = arith.constant 5.000000e-01 : f32
    %45 = vector.broadcast %cst_24 : f32 to vector<8x128xf32>
    %46 = arith.mulf %45, %44 : vector<8x128xf32>
    %47 = math.tanh %46 : vector<8x128xf32>
    %cst_25 = arith.constant 5.000000e-01 : f32
    %48 = vector.broadcast %cst_25 : f32 to vector<8x128xf32>
    %49 = arith.mulf %48, %47 : vector<8x128xf32>
    %cst_26 = arith.constant 5.000000e-01 : f32
    %50 = vector.broadcast %cst_26 : f32 to vector<8x128xf32>
    %51 = arith.addf %49, %50 : vector<8x128xf32>
    %52 = math.tanh %44 : vector<8x128xf32>
    %53 = vector.extract_strided_slice %51 {offsets = [0, 0], sizes = [8, 32], strides = [1, 1]} : vector<8x128xf32> to vector<8x32xf32>
    %54 = vector.extract_strided_slice %51 {offsets = [0, 32], sizes = [8, 32], strides = [1, 1]} : vector<8x128xf32> to vector<8x32xf32>
    %55 = vector.extract_strided_slice %52 {offsets = [0, 64], sizes = [8, 32], strides = [1, 1]} : vector<8x128xf32> to vector<8x32xf32>
    %56 = vector.extract_strided_slice %51 {offsets = [0, 96], sizes = [8, 32], strides = [1, 1]} : vector<8x128xf32> to vector<8x32xf32>
    %57 = arith.mulf %54, %4 : vector<8x32xf32>
    %58 = arith.mulf %53, %55 : vector<8x32xf32>
    %59 = arith.addf %57, %58 : vector<8x32xf32>
    %60 = math.tanh %59 : vector<8x32xf32>
    %61 = arith.mulf %56, %60 : vector<8x32xf32>
    %62 = tpu.concatenate %37, %61, %35, %59 in 1 : vector<8x32xf32>, vector<8x32xf32>, vector<8x32xf32>, vector<8x32xf32> -> vector<8x128xf32>
    %c0_27 = arith.constant 0 : index
    %c0_28 = arith.constant 0 : index
    %63 = vector.load %arg6[%c0_27, %c0_28] : memref<8x128xf32, #tpu.memory_space<vmem>>, vector<8x128xf32>
    tpu.vector_store %arg6[%c0_27, %c0_28], %62 {strides = array<i32>} : memref<8x128xf32, #tpu.memory_space<vmem>>, vector<8x128xf32>,
    return
  }
}

</mosaic_0001>

<bundles_post_ra>
// kernel: lstm_cells_forward.1
= control target key start
LH: loop header
LB: loop body
LE: loop exit
PB: predicated region body
PF: predicated region fallthrough
CT: control target
= control target key end

     0   :  { %v429_v0 = vmov 0.0   ;;  %vm430_vm0 = vmmov 0   ;;  %vm42_vm1 = vcmask 261120   ;;  %vm159_vm2 = vcmask 130048   ;;  %s432_s7 = smov 96   ;;  %s433_s8 = smov 32   ;;  %s542_s4 = inlined_call_operand.vmem [shape: bf16[2,32,128], index: 4, kind: input, shape index: {}]   ;;  %s543_s1 = inlined_call_operand.vmem [shape: f32[8,128], index: 1, kind: input, shape index: {}, may-alias: {1,6}]   ;;  %s544_s2 = inlined_call_operand.vmem [shape: bf16[16,128], index: 2, kind: input, shape index: {}]   ;;  %s545_s0 = inlined_call_operand.vmem [shape: f32[8,16], index: 0, kind: input, shape index: {}]   ;;  %s546_s5 = inlined_call_operand.vmem [shape: f32[2,8,128], index: 5, kind: input, shape index: {}]   ;;  %s547_s3 = inlined_call_operand.vmem [shape: bf16[32,128], index: 3, kind: input, shape index: {}]   ;;  %s548_s6 = inlined_call_operand.vmem [shape: f32[8,128], index: 6, kind: output, shape index: {}, may-alias: {1,6}]  }
   0x1   :  { %375 = vmatprep.subr.bf16.mxu0 %v429_v0  ;;  %v410_v1 = vld [vmem:[%s542_s4] sm:$0xff]   ;;  %379 = vmatprep.mubr.msk.bf16.mxu0 %vm430_vm0, %v429_v0  ;;  %v411_v2 = vld [vmem:[%s542_s4 + $0x8] sm:$0xff]   ;;  %v413_v30 = vld [vmem:[%s542_s4 + $0x10] sm:$0xff]   ;;  %vm339_vm3 = vcmask 523264   ;;  %vm341_vm4 = vcmask 785408  }
   0x2   :  { %383 = vmatprep.subr.bf16.mxu1 %v429_v0  ;;  %387 = vmatprep.mubr.msk.bf16.mxu1 %vm430_vm0, %v429_v0  ;;  %v484_v3 = vld [vmem:[%s543_s1] sm:$0xff]  ;;  %v414_v31 = vld [vmem:[%s542_s4 + $0x18] sm:$0xff]   ;;  %v416_v35 = vld [vmem:[%s547_s3 + $0x8] sm:$0xff]  }
   0x3   :  { %376 = vmatpush3.bf16.msra.mxu0 %v410_v1  ;;  %v25_v4 = vpack.c.bf16 %v484_v3, %v484_v3  ;;  %v412_v5 = vld [vmem:[%s544_s2] sm:$0xff]   ;;  %384 = vmatpush3.bf16.msra.mxu1 %v413_v30  ;;  %v363_v45 = vld [vmem:[%s546_s5 + $0x8] sm:$0xff] }
   0x4   :  { %377 = vmatprep.subr.bf16.mxu0 %v429_v0  ;;  %v149_v6 = vld [vmem:[%s545_s0] sm:$0xff]  ;;  %s431_s0 = smov 64   ;;  %385 = vmatprep.subr.bf16.mxu1 %v429_v0 }
   0x5   :  { %v150_v7 = vpack.c.bf16 %v149_v6, %v149_v6  ;;  %v203_v13 = vld [vmem:[%s546_s5] sm:$0xff] }
   0x6   :  { %v415_v33 = vld [vmem:[%s547_s3] sm:$0xff]  }
   0x7   :  { %378 = vmatpush3.bf16.msra.mxu0 %v411_v2  ;;  %386 = vmatpush3.bf16.msra.mxu1 %v414_v31 }
   0x8   :  { %391 = vmatprep.subr.bf16.mxu0 %v429_v0  ;;  %397 = vmatprep.subr.bf16.mxu1 %v429_v0 }
   0xa   :  { %380 = vmatmul.mubr.msk.bf16.vlgmr.msra.gmra.mrb[0].mxu0 %vm42_vm1, %v25_v4 }
   0xb   :  { %392 = vmatpush3.bf16.msra.mxu0 %v412_v5  ;;  %393 = vmatprep.mubr.msk.bf16.mxu0 %vm430_vm0, %v429_v0 }
  0x12   :  { %394 = vmatmul.mubr.msk.bf16.vlgmr.msra.gmra.mrb[4].mxu0 %vm159_vm2, %v150_v7 }
  0xdd   :  { %v80_v8 = vpop.f32.mrb[0].mxu0 }
  0xde   :  { %v381_v9 = vpop.f32.mrb[1].mxu0 }
  0xdf   :  { %v83_v10 = vpop.f32.mrb[2].mxu0 }
  0xe0   :  { %v382_v11 = vpop.f32.mrb[3].mxu0 }
  0xe5   :  { %v197_v12 = vpop.f32.mrb[4].mxu0 }
  0xe6   :  { %v198_v14 = vadd.f32 %v197_v12, %v80_v8  ;;  %v395_v15 = vpop.f32.mrb[5].mxu0 }
  0xe7   :  { %v200_v16 = vpop.f32.mrb[6].mxu0 }
  0xe8   :  { %v204_v17 = vadd.f32 %v203_v13, %v198_v14  ;;  %v396_v18 = vpop.f32.mrb[7].mxu0 }
  0xea   :  { %417 = vtanh.f32 %v204_v17  ;;  %v205_v20 = vmul.f32 0.5, %v204_v17 }
  0xec   :  { %419 = vtanh.f32 %v205_v20 }
  0xf4   :  { %v418_v19 = vpop.eup %417 }
  0xf5   :  { %216 = vrot.lane.b32.xlu0 %v418_v19, %s431_s0 }
  0xf6   :  { %v420_v21 = vpop.eup %419 }
  0xf7   :  { %v207_v22 = vmul.f32 0.5, %v420_v21 }
  0xf9   :  { %211 = vrot.lane.b32.xlu0 %v484_v3, %s432_s7  ;;  %v208_v23 = vadd.f32 0.5, %v207_v22 }
  0xfd   :  { %92 = vrot.lane.b32.xlu0 %v25_v4, %s432_s7 }
 0x167   :  { %v217_v24 = vpop.permute.xlu0 %216 }
 0x168   :  { %v219_v25 = vmul.f32 %v217_v24, %v208_v23 }
 0x16a   :  { %221 = vrot.lane.b32.xlu1 %v219_v25, %s433_s8 }
 0x16b   :  { %v212_v26 = vpop.permute.xlu0 %211 }
 0x16c   :  { %v214_v27 = vmul.f32 %v212_v26, %v208_v23 }
 0x16f   :  { %v93_v32 = vpop.permute.xlu0 %92 }
 0x170   :  { %388 = vmatmul.mubr.msk.bf16.vlgmr.msra.gmra.mrb[0].mxu1 %vm42_vm1, %v93_v32 }
 0x171   :  { %398 = vmatpush3.bf16.msra.mxu1 %v415_v33  ;;  %401 = vmatprep.mubr.msk.bf16.mxu1 %vm430_vm0, %v429_v0 }
 0x172   :  { %399 = vmatprep.subr.bf16.mxu1 %v429_v0 }
 0x175   :  { %400 = vmatpush3.bf16.msra.mxu1 %v416_v35 }
 0x1dc   :  { %v222_v28 = vpop.permute.xlu1 %221 }
 0x1dd   :  { %v224_v29 = vadd.f32 %v222_v28, %v214_v27 }
 0x1df   :  { %421 = vtanh.f32 %v224_v29 }
 0x1e9   :  { %v422_v34 = vpop.eup %421 }
 0x1ea   :  { %227 = vrot.lane.b32.xlu1 %v422_v34, %s431_s0 }
 0x243   :  { %v143_v39 = vpop.f32.mrb[0].mxu1 }
 0x244   :  { %v389_v40 = vpop.f32.mrb[1].mxu1 }
 0x245   :  { %v146_v41 = vpop.f32.mrb[2].mxu1 }
 0x246   :  { %v390_v42 = vpop.f32.mrb[3].mxu1 }
 0x25c   :  { %v228_v36 = vpop.permute.xlu1 %227 }
 0x25d   :  { %v230_v37 = vmul.f32 %v228_v36, %v208_v23 }
 0x25f   :  { %v231_v38 = vpack.c.bf16 %v230_v37, %v230_v37 }
 0x261   :  { %237 = vrot.lane.b32.xlu1 %v231_v38, %s433_s8 }
 0x265   :  { %302 = vrot.lane.b32.xlu1 %v484_v3, %s431_s0 }
 0x2d3   :  { %v238_v43 = vpop.permute.xlu1 %237 }
 0x2d4   :  { %402 = vmatmul.mubr.msk.bf16.vlgmr.msra.gmra.mrb[4].mxu1 %vm42_vm1, %v238_v43 }
 0x2d7   :  { %v303_v58 = vpop.permute.xlu1 %302 }
 0x3a7   :  { %v288_v44 = vpop.f32.mrb[4].mxu1 }
 0x3a8   :  { %v289_v46 = vadd.f32 %v288_v44, %v143_v39  ;;  %v403_v47 = vpop.f32.mrb[5].mxu1 }
 0x3a9   :  { %v291_v48 = vpop.f32.mrb[6].mxu1 }
 0x3aa   :  { %v296_v49 = vadd.f32 %v363_v45, %v289_v46  ;;  %v404_v50 = vpop.f32.mrb[7].mxu1 }
 0x3ac   :  { %423 = vtanh.f32 %v296_v49  ;;  %v297_v52 = vmul.f32 0.5, %v296_v49 }
 0x3ae   :  { %425 = vtanh.f32 %v297_v52 }
 0x3b6   :  { %v424_v51 = vpop.eup %423 }
 0x3b7   :  { %307 = vrot.lane.b32.xlu0 %v424_v51, %s431_s0 }
 0x3b8   :  { %v426_v53 = vpop.eup %425 }
 0x3b9   :  { %v299_v54 = vmul.f32 0.5, %v426_v53 }
 0x3bb   :  { %v300_v55 = vadd.f32 0.5, %v299_v54 }
 0x3bd   :  { %v305_v59 = vmul.f32 %v303_v58, %v300_v55 }
 0x429   :  { %v308_v56 = vpop.permute.xlu0 %307 }
 0x42a   :  { %v310_v57 = vmul.f32 %v308_v56, %v300_v55 }
 0x42c   :  { %312 = vrot.lane.b32.xlu0 %v310_v57, %s433_s8 }
 0x430   :  { %323 = vrot.lane.b32.xlu0 %v230_v37, %s433_s8 }
 0x434   :  { %331 = vrot.lane.b32.xlu0 %v224_v29, %s433_s8 }
 0x49e   :  { %v313_v60 = vpop.permute.xlu0 %312 }
 0x49f   :  { %v315_v61 = vadd.f32 %v313_v60, %v305_v59 }
 0x4a1   :  { %427 = vtanh.f32 %v315_v61 }
 0x4a2   :  { %v324_v1 = vpop.permute.xlu0 %323 }
 0x4a6   :  { %v332_v4 = vpop.permute.xlu0 %331 }
 0x4ab   :  { %v428_v62 = vpop.eup %427 }
 0x4ac   :  { %318 = vrot.lane.b32.xlu1 %v428_v62, %s431_s0 }
 0x51e   :  { %v319_v63 = vpop.permute.xlu1 %318 }
 0x51f   :  { %v321_v0 = vmul.f32 %v319_v63, %v300_v55 }
 0x521   :  { %327 = vrot.lane.b32.xlu1 %v321_v0, %s431_s0 }
 0x525   :  { %335 = vrot.lane.b32.xlu1 %v315_v61, %s431_s0 }
 0x593   :  { %v328_v2 = vpop.permute.xlu1 %327 }
 0x594   :  { %v338_v3 = vsel %vm42_vm1, %v324_v1, %v328_v2 }
 0x595   :  { %v340_v5 = vsel %vm339_vm3, %v338_v3, %v332_v4 }
 0x597   :  { %v336_v6 = vpop.permute.xlu1 %335 }
 0x598   :  { %v342_v7 = vsel %vm341_vm4, %v340_v5, %v336_v6 }
 0x599   :  { %343 = vst [vmem:[%s548_s6] sm:$0xff] %v342_v7 }

</bundles_post_ra>
